<compile_context>
chip_gen: v5e
topology: v5e:2x2
jax: 0.10.0
libtpu: 0.0.40
codegen_flags: <defaults>
</compile_context>

<pallas_src>
import functools

import jax
import jax.numpy as jnp
from jax.experimental import pallas as pl
from jax.experimental.pallas import tpu as pltpu

NUM_OPS = 4  # relu, sigmoid, tanh, identity


def act_mix_kernel(w_ref, x_ref, o_ref):
    """w_ref: SMEM f32[NUM_OPS]; x_ref/o_ref: VMEM [tile_rows, D]."""
    # Hoist scalar (SMEM) reads before the vector math.
    w_relu = w_ref[0]
    w_sig = w_ref[1]
    w_tanh = w_ref[2]
    w_id = w_ref[3]

    x = x_ref[...].astype(jnp.float32)

    # identity + relu folded:  w_id*x + w_relu*relu(x) == x*(w_id + w_relu*(x>0))
    relu_gate = (x > 0.0).astype(jnp.float32)
    acc = x * (w_id + w_relu * relu_gate)

    # sigmoid(x) = 0.5*(tanh(0.5*x) + 1)  -> one EUP tanh, no exp/divide.
    t_half = jnp.tanh(0.5 * x)
    acc = acc + (0.5 * w_sig) * t_half + (0.5 * w_sig)

    # tanh term (second and last EUP op per element).
    acc = acc + w_tanh * jnp.tanh(x)

    o_ref[...] = acc.astype(o_ref.dtype)


def _choose_tile_rows(m_rows):
    """Large streaming tiles, but keep >= 2 grid steps (v7x megacore) and a
    footprint inside every generation's scoped-VMEM default."""
    # 2048 rows x 128 lanes x 4 B = 1 MiB/buffer; double-buffered in+out ~4 MiB
    # -> fits v5e's 16 MiB and v6e/v7x's 32 MiB scoped VMEM with headroom.
    target = 2048
    half = pl.next_power_of_2(pl.cdiv(m_rows, 2))
    return int(max(8, min(target, half)))


@functools.partial(jax.jit, static_argnames=("tile_rows",))
def act_mix_op(emb, weights, *, tile_rows=None):
    """Pallas implementation of ActMixOp.forward(emb, weights).

    emb: [B, F, D]; weights: [NUM_OPS] architecture (mixture) weights.
    """
    B, F, D = emb.shape
    M = B * F
    x2d = emb.reshape(M, D)

    if tile_rows is None:
        tile_rows = _choose_tile_rows(M)

    # Ragged M: pad to a tile multiple instead of asserting divisibility.
    n_tiles = pl.cdiv(M, tile_rows)
    m_pad = n_tiles * tile_rows
    if m_pad != M:
        x2d = jnp.pad(x2d, ((0, m_pad - M), (0, 0)))

    grid_spec = pltpu.PrefetchScalarGridSpec(
        num_scalar_prefetch=1,              # weights -> SMEM, first kernel ref
        grid=(n_tiles,),
        in_specs=[pl.BlockSpec((tile_rows, D), lambda i, w: (i, 0))],
        out_specs=pl.BlockSpec((tile_rows, D), lambda i, w: (i, 0)),
    )

    out2d = pl.pallas_call(
        act_mix_kernel,
        out_shape=jax.ShapeDtypeStruct((m_pad, D), emb.dtype),
        grid_spec=grid_spec,
        compiler_params=pltpu.CompilerParams(
            dimension_semantics=("parallel",)),
    )(weights.astype(jnp.float32), x2d)

    if m_pad != M:
        out2d = out2d[:M]
    return out2d.reshape(B, F, D)


def act_mix_ref(emb, weights):
    """Pure-JAX reference (mirrors the PyTorch loop)."""
    ops = [
        lambda x: jnp.maximum(x, 0.0),
        jax.nn.sigmoid,
        jnp.tanh,
        lambda x: x,
    ]
    return sum(w * op(emb) for w, op in zip(weights, ops))


if __name__ == "__main__":
    key = jax.random.PRNGKey(0)
    k_emb, k_w = jax.random.split(key)

    # Small shapes consistent with the module: batch=2, fields=8, dim=128.
    emb = jax.random.normal(k_emb, (2, 8, 128), dtype=jnp.float32)
    # Architecture weights (one per activation primitive), softmax-normalized.
    weights = jax.nn.softmax(jax.random.normal(k_w, (NUM_OPS,), dtype=jnp.float32))

    # TODO(synk): reset_parameters() is a no-op here — all ACT_OPS primitives
    # (relu/sigmoid/tanh/identity) are parameter-free.

    out = act_mix_op(emb, weights)
    out = jax.block_until_ready(out)

    ref = act_mix_ref(emb, weights)
    assert out.shape == emb.shape and out.dtype == emb.dtype
    # tanh-based sigmoid differs from jax.nn.sigmoid only at the ULP level.
    assert jnp.allclose(out, ref, atol=1e-5, rtol=1e-5)

    print("KERNEL_OK")
</pallas_src>

<mosaic_0001>
module attributes {stable_mosaic.version = 11 : i64} {
  func.func @act_mix_kernel(%arg0: i32, %arg1: memref<4xf32, #tpu.memory_space<smem>>, %arg2: memref<8x128xf32, #tpu.memory_space<vmem>>, %arg3: memref<8x128xf32, #tpu.memory_space<vmem>>) attributes {dimension_semantics = [#tpu.dimension_semantics<parallel>], iteration_bounds = array<i64: 2>, scalar_prefetch = 1 : i64, scratch_operands = 0 : i64, tpu.core_type = #tpu.core_type<tc>, window_params = [{transform_indices = @transform_0, window_bounds = array<i64: 8, 128>}, {transform_indices = @transform_1, window_bounds = array<i64: 8, 128>}]} {
    %c0 = arith.constant 0 : index
    %0 = memref.load %arg1[%c0] : memref<4xf32, #tpu.memory_space<smem>>
    %c1 = arith.constant 1 : index
    %1 = memref.load %arg1[%c1] : memref<4xf32, #tpu.memory_space<smem>>
    %c2 = arith.constant 2 : index
    %2 = memref.load %arg1[%c2] : memref<4xf32, #tpu.memory_space<smem>>
    %c3 = arith.constant 3 : index
    %3 = memref.load %arg1[%c3] : memref<4xf32, #tpu.memory_space<smem>>
    %c0_0 = arith.constant 0 : index
    %c0_1 = arith.constant 0 : index
    %4 = vector.load %arg2[%c0_0, %c0_1] : memref<8x128xf32, #tpu.memory_space<vmem>>, vector<8x128xf32>
    %cst = arith.constant 0.000000e+00 : f32
    %5 = vector.broadcast %cst : f32 to vector<8x128xf32>
    %6 = arith.cmpf ogt, %4, %5 : vector<8x128xf32>
    %7 = arith.extui %6 : vector<8x128xi1> to vector<8x128xi32>
    %8 = arith.sitofp %7 : vector<8x128xi32> to vector<8x128xf32>
    %9 = vector.broadcast %0 : f32 to vector<8x128xf32>
    %10 = arith.mulf %9, %8 : vector<8x128xf32>
    %11 = vector.broadcast %3 : f32 to vector<8x128xf32>
    %12 = arith.addf %11, %10 : vector<8x128xf32>
    %13 = arith.mulf %4, %12 : vector<8x128xf32>
    %cst_2 = arith.constant 5.000000e-01 : f32
    %14 = vector.broadcast %cst_2 : f32 to vector<8x128xf32>
    %15 = arith.mulf %14, %4 : vector<8x128xf32>
    %16 = math.tanh %15 : vector<8x128xf32>
    %cst_3 = arith.constant 5.000000e-01 : f32
    %17 = arith.mulf %cst_3, %1 : f32
    %18 = vector.broadcast %17 : f32 to vector<8x128xf32>
    %19 = arith.mulf %18, %16 : vector<8x128xf32>
    %20 = arith.addf %13, %19 : vector<8x128xf32>
    %cst_4 = arith.constant 5.000000e-01 : f32
    %21 = arith.mulf %cst_4, %1 : f32
    %22 = vector.broadcast %21 : f32 to vector<8x128xf32>
    %23 = arith.addf %20, %22 : vector<8x128xf32>
    %24 = math.tanh %4 : vector<8x128xf32>
    %25 = vector.broadcast %2 : f32 to vector<8x128xf32>
    %26 = arith.mulf %25, %24 : vector<8x128xf32>
    %27 = arith.addf %23, %26 : vector<8x128xf32>
    %c0_5 = arith.constant 0 : index
    %c0_6 = arith.constant 0 : index
    %28 = vector.load %arg3[%c0_5, %c0_6] : memref<8x128xf32, #tpu.memory_space<vmem>>, vector<8x128xf32>
    tpu.vector_store %arg3[%c0_5, %c0_6], %27 {strides = array<i32>} : memref<8x128xf32, #tpu.memory_space<vmem>>, vector<8x128xf32>,
    return
  }
  func.func @transform_0(%arg0: i32, %arg1: memref<4xf32, #tpu.memory_space<smem>>) -> (i32, i32) {
    %c0_i32 = arith.constant 0 : i32
    %c0_i32_0 = arith.constant 0 : i32
    return %arg0, %c0_i32 : i32, i32
  }
  func.func @transform_1(%arg0: i32, %arg1: memref<4xf32, #tpu.memory_space<smem>>) -> (i32, i32) {
    %c0_i32 = arith.constant 0 : i32
    %c0_i32_0 = arith.constant 0 : i32
    return %arg0, %c0_i32 : i32, i32
  }
}

</mosaic_0001>

<bundles_post_ra>
// kernel: act_mix_op.1
= control target key start
LH: loop header
LB: loop body
LE: loop exit
PB: predicated region body
PF: predicated region fallthrough
CT: control target
= control target key end

     0   :  { %s434_s12 = smov [#allocation3]   ;;  %s585_s0 = inlined_call_operand.vmem [shape: f32[4], index: 0, kind: input, shape index: {}]   ;;  %s586_s1 = inlined_call_operand.hbm [shape: f32[16,128], index: 1, kind: input, shape index: {}]   ;;  %s587_s2 = inlined_call_operand.hbm [shape: f32[16,128], index: 2, kind: output, shape index: {}]  }
   0x1   :  { %s8_s11 = sshll.u32 %s585_s0, 4  ;;  %s9_s11 = int_to_ptr.vmem [resolvable:$true] %s8_s11 }
   0x2   :  { %11 = dma.vmem_to_smem %s9_s11, 16, %s434_s12, [#allocation2] }
   0x3   :  { %408 = dma.done.wait [#allocation2], 16 }
   0x4   :  { %409 = vsyncadd [#allocation2], 4294967280 }
   0x5   :  { %14 = sfence }
   0x6   :  { %15 = vsyncpa [#allocation5], 0 }
   0x7   :  { %17 = vsyncpa [#allocation5 + $0x1], 0 }
   0x8   :  { %18 = vsyncpa [#allocation6], 0 }
   0x9   :  { %20 = vsyncpa [#allocation6 + $0x1], 0  ;;  %s454_s13 = smov 0   ;;  %s456_s14 = smov 0  }
   0xa   :  { %s458_s15 = smov 0   ;;  %s460_s16 = smov 0  }
   0xb LB: > { %s475_s0 = sadd.s32 4294967295, %s432_s16   ;;  %s254_s17 = sadd.s32 4294967294, %s432_s16   ;;  %s432_s16 = sphi %s460_s16, %s597_s16   ;;  %s428_s15 = sphi %s458_s15, %s596_s15   ;;  %s424_s14 = sphi %s456_s14, %s595_s14   ;;  %s420_s13 = sphi %s454_s13, %s594_s13  }
   0xc   : > { %s479_s18 = sadd.s32 1, %s432_s16   ;;  %s33_s19 = sadd.s32 1, %s428_s15 }
   0xd   : > { %s30_s20 = ssub.s32 %s432_s16, %s479_s18  ;;  %p40_p0 = scmp.ne.s32.totalorder %s428_s15, %s424_s14 }
   0xe   : > { %p31_p1 = scmp.eq.s32.totalorder %s30_s20, 0  ;;  %p41_p2 = scmp.eq.s32.totalorder %s432_s16, 0 }
   0xf   : > { %p46_p3 = scmp.ne.s32.totalorder %s424_s14, %s420_s13  ;;  %p47_p4 = scmp.eq.s32.totalorder %s475_s0, 0 }
  0x10   : > { %s491_s21 = scalar_select %p31_p1, %s428_s15, %s33_s19  }
  0x11   : > { %p493_p5 = por %p41_p2, %p40_p0  ;;  %p497_p6 = por %p47_p4, %p46_p3 }
  0x12   : > { %p70_p7 = scmp.eq.s32.totalorder %s475_s0, 1  ;;  %p76_p8 = scmp.eq.s32.totalorder %s254_s17, 1 }
  0x13   : > { %p282_p10 = scmp.lt.s32.totalorder %s432_s16, 2  ;;  %s96_s26 = sand.u32 1, %s428_s15  }
  0x14   : > { %p504_p11 = por %p70_p7, %p40_p0  ;;  %p508_p12 = por %p76_p8, %p46_p3 }
  0x15   : > { %s258_s27 = sshll.u32 %s432_s16, 3  ;;  %s257_s28 = sshll.u32 %s96_s26, 3 }
  0x16   : > { %s104_s3 = scalar_lea.hbm %s586_s1, %s258_s27  ;;  %s100_s5 = scalar_lea.vmem [#allocation4], %s257_s28 }
  0x17   : > { %s106_s4 = sshll.u32 %s104_s3, 4  ;;  %s108_s6 = sshll.u32 %s100_s5, 4  ;;  %s107_s4 = int_to_ptr.hbm [resolvable:$true] %s106_s4  ;;  %s109_s6 = int_to_ptr.vmem [resolvable:$true] %s108_s6 }
  0x18   : > { %p519_p13 = pnand %p282_p10, %p493_p5  ;;  %p259_p0 = scmp.ge.s32.totalorder %s432_s16, 1 }
  0x19   : > { %p113_p1 = scmp.lt.s32.totalorder %s432_s16, 3  ;;  %s97_s8 = scalar_lea.sflag [#allocation5], %s96_s26 }
  0x1a   : > { %s334_s9 = sshra.s32 %s107_s4, 4  ;;  %p338_p3 = pneg %p519_p13  ;;  %s335_s9 = int_to_ptr.hbm [resolvable:$true] %s334_s9 }
  0x1b   : > { %s336_s10 = scalar_lea.hbm %s335_s9, 8  ;;  %s341_s17 = scalar_lea.hbm %s586_s1, 16 }
  0x1c   : > { %p337_p2 = scmp.ne.s32.totalorder %s335_s9, %s336_s10  ;;  %p342_p5 = scmp.lt.s32.totalorder %s335_s9, %s586_s1 }
  0x1d   : > { %p343_p8 = scmp.lt.s32.totalorder %s341_s17, %s336_s10 }
  0x1e   : > { %p339_p4 = pnand %p338_p3, %p337_p2 }
  0x1f   : > { %p344_p10 = por %p343_p8, %p342_p5 }
  0x20   : > { %p340_p7 = pneg %p339_p4 }
  0x22   : > { %p345_p9 = pnand %p344_p10, %p340_p7 }
  0x24   : > { %348 = shalt.err (!%p345_p9)
}
  0x25   : > { %277 = dma.hbm_to_vmem [thread:$0]  (!%p519_p13), %s107_s4, 128, %s109_s6, %s97_s8  }
  0x26   : > { %p114_p2 = pnand %p259_p0, %p113_p1 }
  0x27   : > { %s540_s22 = sand.u32 (!%p114_p2), 1, %s424_s14  }
  0x28   : > { %117 = sbr.rel (%p114_p2) target bundleno = 68 (0x44), region = 24  ;;  %s260_s26 = sshll.u32 (!%p114_p2), %s540_s22, 3 }
  0x29   : > { %s120_s27 = scalar_lea.sflag (!%p114_p2), [#allocation5], %s540_s22  ;;  %s123_s28 = scalar_lea.vmem (!%p114_p2), [#allocation4], %s260_s26 }
  0x2d   : > { %411 = dma.done.wait (%p497_p6), %s120_s27, 128  }
  0x2e   : > { %413 = vsyncadd (%p497_p6), %s120_s27, 4294967168  ;;  %s143_s29 = sld [smem:[#allocation3]]  ;;  %v147_v1 = vld [vmem:[%s123_s28] sm:$0xff]  ;;  %v435_v3 = vmov 0.0   ;;  %s267_s23 = sshll.u32 %s475_s0, 3 }
  0x2f   : > { %s264_s30 = sld [smem:[#allocation3 + $0x3]]  ;;  %vm148_vm0 = vcmp.gt.f32.partialorder %v147_v1, 0.0  ;;  %v156_v2 = vmul.f32 0.5, %v147_v1  ;;  %318 = vtanh.f32 %v147_v1  ;;  %s179_s8 = scalar_lea.hbm %s587_s2, %s267_s23 }
  0x30   : > { %s262_s3 = sld [smem:[#allocation3 + $0x1]]  ;;  %v265_v4 = vsel %vm148_vm0, 1.0, %v435_v3  ;;  %s142_s9 = scalar_lea.vmem [#allocation7], %s260_s26 }
  0x31   : > { %s263_s4 = sld [smem:[#allocation3 + $0x2]]  ;;  %320 = vtanh.f32 %v156_v2  ;;  %s181_s10 = sshll.u32 %s142_s9, 4  ;;  %s182_s10 = int_to_ptr.vmem [resolvable:$true] %s181_s10 }
  0x32   : > { %s183_s11 = sshll.u32 %s179_s8, 4  ;;  %s169_s0 = scalar_lea.sflag [#allocation6], %s540_s22  ;;  %s184_s11 = int_to_ptr.hbm [resolvable:$true] %s183_s11 }
  0x33   : > { %s378_s12 = sshra.s32 %s184_s11, 4  ;;  %s384_s27 = scalar_lea.hbm %s587_s2, 16  ;;  %s379_s12 = int_to_ptr.hbm [resolvable:$true] %s378_s12 }
  0x34   : > { %v151_v0 = vstv %s143_s29  ;;  %s380_s17 = scalar_lea.hbm %s379_s12, 8  ;;  %p385_p0 = scmp.lt.s32.totalorder %s379_s12, %s587_s2 }
  0x35   : > { %v153_v5 = vstv %s264_s30  ;;  %v152_v6 = vmul.f32 %v265_v4, %v151_v0  ;;  %v319_v9 = vpop.eup %318  ;;  %p381_p6 = scmp.ne.s32.totalorder %s379_s12, %s380_s17  ;;  %p386_p1 = scmp.lt.s32.totalorder %s384_s27, %s380_s17 }
  0x36   : > { %s158_s5 = smul.f32 0.5, %s262_s3 }
  0x37   : > { %v154_v7 = vadd.f32 %v153_v5, %v152_v6  ;;  %v321_v11 = vpop.eup %320  ;;  %v164_v12 = vstv %s263_s4  ;;  %p382_p9 = pnand %p381_p6, %p504_p11  ;;  %p387_p3 = por %p386_p1, %p385_p0 }
  0x38   : > { %v159_v8 = vstv %s158_s5  ;;  %v165_v15 = vmul.f32 %v319_v9, %v164_v12 }
  0x39   : > { %v155_v10 = vmul.f32 %v154_v7, %v147_v1  ;;  %v160_v13 = vmul.f32 %v321_v11, %v159_v8  ;;  %p383_p13 = pneg %p382_p9 }
  0x3b   : > { %v161_v14 = vadd.f32 %v160_v13, %v155_v10  ;;  %p388_p4 = pnand %p387_p3, %p383_p13 }
  0x3d   : > { %v162_v16 = vadd.f32 %v161_v14, %v159_v8 }
  0x3f   : > { %v166_v17 = vadd.f32 %v165_v15, %v162_v16 }
  0x41   : > { %167 = vst [vmem:[%s142_s9] sm:$0xff] %v166_v17 }
  0x42   : > { %391 = shalt.err (!%p388_p4)
}
  0x43   : > { %272 = dma.vmem_to_hbm [thread:$0]  (%p504_p11), %s182_s10, 128, %s184_s11, %s169_s0  }
  0x44 PF: > { %s195_s22 = sand.u32 1, %s420_s13   ;;  %p593_p7 = scmp.ge.s32.totalorder %s432_s16, 2 }
  0x45   : > { %s196_s29 = scalar_lea.sflag [#allocation6], %s195_s22 }
  0x46   : > { %p279_p5 = pnand %p593_p7, %p508_p12 }
  0x48   : > { %p280_p8 = pneg %p279_p5 }
  0x4a   : > { %415 = dma.done.wait (%p280_p8), %s196_s29, 128  }
  0x4b   : > { %417 = vsyncadd (%p280_p8), %s196_s29, 4294967168  ;;  %p23_p10 = scmp.ge.s32.totalorder %s479_s18, 4   ;;  %s594_s13 = smov %s424_s14 }
  0x4c   : > { %s595_s14 = smov %s428_s15  ;;  %s596_s15 = smov %s491_s21 }
  0x4d   : > { %s597_s16 = smov %s479_s18  ;;  %25 = sbr.rel (!%p23_p10) target bundleno = 11 (0xb), region = 69 }
  0x52   :  { %202 = vsyncpa [#allocation5], 1 }
  0x53   :  { %204 = vsyncpa [#allocation5 + $0x1], 1 }
  0x54   :  { %205 = vsyncpa [#allocation6], 1 }
  0x55   :  { %207 = vsyncpa [#allocation6 + $0x1], 1 }

</bundles_post_ra>
